<compile_context>
chip_gen: v7x
topology: tpu7x:2x2x1
jax: 0.10.0
libtpu: 0.0.40
codegen_flags: <defaults>
</compile_context>

<pallas_src>
from functools import partial

import jax
import jax.numpy as jnp
from jax.experimental import pallas as pl
from jax.experimental.pallas import tpu as pltpu


def _round_up(x, m):
    return ((x + m - 1) // m) * m


# ---------------------------------------------------------------------------
# fused kernel: global avg+max pool (reduction over grid axis 1)
#               + fc1 / relu / fc2 / add / sigmoid epilogue on the last step
# ---------------------------------------------------------------------------
def _ca_kernel(x_ref, w1_ref, w2_ref, o_ref, sum_acc, max_acc,
               *, inv_hw, rem, tile_hw, num_hw_blocks, tile_n):
    s = pl.program_id(1)
    last = num_hw_blocks - 1

    @pl.when(s == 0)
    def _init():
        sum_acc[...] = jnp.zeros_like(sum_acc)
        max_acc[...] = jnp.full_like(max_acc, -jnp.inf)

    x = x_ref[...].astype(jnp.float32)                     # (tile_n, C, tile_hw)

    def _accumulate(xs, xm):
        sum_acc[...] += jnp.sum(xs, axis=2)                # (tile_n, C)
        max_acc[...] = jnp.maximum(max_acc[...], jnp.max(xm, axis=2))

    if rem != tile_hw:
        # Ragged spatial remainder: mask ONLY on the last reduction step so the
        # steady-state loop carries no extra VALU work per vreg.
        @pl.when(s < last)
        def _steady():
            _accumulate(x, x)

        @pl.when(s == last)
        def _ragged():
            valid = jax.lax.broadcasted_iota(jnp.int32, x.shape, 2) < rem
            _accumulate(jnp.where(valid, x, 0.0),
                        jnp.where(valid, x, -jnp.inf))
    else:
        _accumulate(x, x)

    @pl.when(s == last)
    def _epilogue():
        avg = sum_acc[...] * jnp.float32(inv_hw)           # (tile_n, C)
        mx = max_acc[...]                                  # (tile_n, C)
        # Stack avg/max -> single fc1 dot; fold the add before the single fc2
        # dot (fc2 is linear): 2 MXU dots total instead of 4.
        pooled = jnp.concatenate([avg, mx], axis=0)        # (2*tile_n, C)
        h = jnp.maximum(
            jnp.dot(pooled, w1_ref[...], preferred_element_type=jnp.float32),
            0.0)                                           # (2*tile_n, Chp)
        h = h[:tile_n] + h[tile_n:]                        # (tile_n, Chp)
        y = jnp.dot(h, w2_ref[...], preferred_element_type=jnp.float32)
        att = 1.0 / (1.0 + jnp.exp(-y))                    # (tile_n, C)
        o_ref[...] = att.reshape(tile_n, -1, 1).astype(o_ref.dtype)


def channel_attention(x_nchw, w1, w2):
    """x: (N, C, H, W); w1 = fc1.weight.T as (C, C//16); w2 = fc2.weight.T as (C//16, C).

    Returns sigmoid channel-attention weights of shape (N, C, 1, 1) (PyTorch semantics,
    bias=False as in the module).
    """
    N, C, H, W = x_nchw.shape
    Cin, Ch = w1.shape
    assert Cin == C and w2.shape == (Ch, C)
    assert Ch >= 1, "in_planes must be >= 16 (module hard-codes // 16)"
    HW = H * W
    itemsize = x_nchw.dtype.itemsize

    # NCHW -> (N, C, HW): free reshape, no HBM data movement.
    x = x_nchw.reshape(N, C, HW)

    # Pad ONLY the tiny hidden dim of the weights to 128 lanes (zero cols/rows
    # of w1 / w2 do not change the result).
    Chp = _round_up(Ch, 128)
    w1p = jnp.zeros((C, Chp), jnp.float32).at[:, :Ch].set(w1.astype(jnp.float32))
    w2p = jnp.zeros((Chp, C), jnp.float32).at[:Ch, :].set(w2.astype(jnp.float32))

    # ---- generation-aware VMEM budget -------------------------------------
    try:
        vmem_cap = int(pltpu.get_tpu_info().vmem_capacity_bytes)
    except Exception:                                       # pragma: no cover
        vmem_cap = 64 * 1024 * 1024                         # conservative (v7x per-TC)
    # Scoped budget for this call: <= 3/4 of physical and never more than 48 MiB
    # (full pipelining depth on v5e/v6e's 128 MiB and v7x's 64 MiB VMEM).
    vmem_budget = min((vmem_cap * 3) // 4, 48 * 1024 * 1024)

    weight_bytes = 2 * (C * Chp * 4) * 2                    # w1p + w2p, double-buffered
    scratch_bytes = 2 * _round_up(max(N, 8), 8) * _round_up(C, 128) * 4
    out_bytes = 2 * N * _round_up(C, 128) * 4
    overhead = weight_bytes + scratch_bytes + out_bytes + (1 << 20)
    x_block_budget = max(1 << 20, (vmem_budget - overhead) // 2)   # per input buffer

    sample_bytes = C * HW * itemsize                         # one full (C, HW) slab
    if sample_bytes <= x_block_budget:
        # Whole spatial extent resident -> fully contiguous HBM reads; tile over N
        # ('parallel' grid axis -> both TensorCores on v7x when N allows it).
        tile_hw = HW
        tile_n = min(N, max(1, x_block_budget // sample_bytes))
    else:
        # A single sample does not fit: reduce over 128-lane-aligned spatial tiles.
        tile_n = 1
        tile_hw = min(HW, max(128, ((x_block_budget // (C * itemsize)) // 128) * 128))
    num_n_blocks = pl.cdiv(N, tile_n)
    num_hw_blocks = pl.cdiv(HW, tile_hw)
    rem = HW - (num_hw_blocks - 1) * tile_hw                 # valid cols in last tile

    x_block_bytes = tile_n * C * tile_hw * itemsize
    vmem_needed = 2 * x_block_bytes + overhead
    vmem_limit_bytes = int(min(max(vmem_needed, 32 * 1024 * 1024),
                               (vmem_cap * 7) // 8))

    # Advisory cost estimate (HBM-streaming-bound call).
    flops = 2.0 * N * C * HW + 2.0 * (2 * N) * C * Chp + 2.0 * N * Chp * C
    bytes_accessed = N * C * HW * itemsize + 2 * C * Chp * 4 + N * C * itemsize
    cost = pl.CostEstimate(flops=int(flops), transcendentals=int(N * C),
                           bytes_accessed=int(bytes_accessed))

    out = pl.pallas_call(
        partial(_ca_kernel, inv_hw=1.0 / HW, rem=rem, tile_hw=tile_hw,
                num_hw_blocks=num_hw_blocks, tile_n=tile_n),
        out_shape=jax.ShapeDtypeStruct((N, C, 1), x_nchw.dtype),
        grid_spec=pltpu.PrefetchScalarGridSpec(
            num_scalar_prefetch=0,
            grid=(num_n_blocks, num_hw_blocks),
            in_specs=[
                pl.BlockSpec((tile_n, C, tile_hw), lambda n, s: (n, 0, s)),
                pl.BlockSpec((C, Chp), lambda n, s: (0, 0)),
                pl.BlockSpec((Chp, C), lambda n, s: (0, 0)),
            ],
            out_specs=pl.BlockSpec((tile_n, C, 1), lambda n, s: (n, 0, 0)),
            scratch_shapes=[pltpu.VMEM((tile_n, C), jnp.float32),   # running sum
                            pltpu.VMEM((tile_n, C), jnp.float32)],  # running max
        ),
        compiler_params=pltpu.CompilerParams(
            dimension_semantics=("parallel", "arbitrary"),
            vmem_limit_bytes=vmem_limit_bytes),
        cost_estimate=cost,
    )(x, w1p, w2p)

    return out.reshape(N, C, 1, 1)


# ---------------------------------------------------------------------------
# pure-JAX reference (same math as the PyTorch module, bias=False, eval mode)
# ---------------------------------------------------------------------------
def channel_attention_ref(x, w1, w2):
    avg = jnp.mean(x.astype(jnp.float32), axis=(2, 3))       # (N, C)
    mx = jnp.max(x.astype(jnp.float32), axis=(2, 3))         # (N, C)

    def mlp(v):
        return jnp.maximum(v @ w1, 0.0) @ w2

    y = mlp(avg) + mlp(mx)
    return jax.nn.sigmoid(y).reshape(x.shape[0], x.shape[1], 1, 1)


if __name__ == "__main__":
    key = jax.random.PRNGKey(0)
    kx, k1, k2 = jax.random.split(key, 3)

    # Shapes consistent with the module: ratio is hard-coded // 16, so
    # in_planes must be >= 16.  N=2, C=64, H=W=16 -> hidden dim = 4.
    N, C, H, W = 2, 64, 16, 16
    Ch = C // 16

    x = jax.random.normal(kx, (N, C, H, W), dtype=jnp.float32)
    # fc1.weight (Ch, C, 1, 1) stored here as its transpose (C, Ch); likewise fc2.
    w1 = jax.random.normal(k1, (C, Ch), dtype=jnp.float32) * (1.0 / (C ** 0.5))
    w2 = jax.random.normal(k2, (Ch, C), dtype=jnp.float32) * (1.0 / (Ch ** 0.5))

    fwd = jax.jit(channel_attention)
    out = jax.block_until_ready(fwd(x, w1, w2))

    assert out.shape == (N, C, 1, 1), out.shape
    assert bool(jnp.all(jnp.isfinite(out)))

    ref = channel_attention_ref(x, w1, w2)
    assert bool(jnp.allclose(out, ref, atol=1e-5, rtol=1e-5)), (
        float(jnp.max(jnp.abs(out - ref))))

    print("KERNEL_OK")
</pallas_src>

<mosaic_0001>
module attributes {stable_mosaic.version = 11 : i64} {
  func.func @_ca_kernel(%arg0: i32, %arg1: i32, %arg2: memref<2x64x256xf32, #tpu.memory_space<vmem>>, %arg3: memref<64x128xf32, #tpu.memory_space<vmem>>, %arg4: memref<128x64xf32, #tpu.memory_space<vmem>>, %arg5: memref<2x64x1xf32, #tpu.memory_space<vmem>>, %arg6: memref<2x64xf32, #tpu.memory_space<vmem>>, %arg7: memref<2x64xf32, #tpu.memory_space<vmem>>) attributes {dimension_semantics = [#tpu.dimension_semantics<parallel>, #tpu.dimension_semantics<arbitrary>], iteration_bounds = array<i64: 1, 1>, scalar_prefetch = 0 : i64, scratch_operands = 2 : i64, tpu.core_type = #tpu.core_type<tc>, window_params = [{transform_indices = @transform_0, window_bounds = array<i64: 2, 64, 256>}, {pipeline_mode = #tpu.pipeline_mode<synchronous>, transform_indices = @transform_1, window_bounds = array<i64: 64, 128>}, {pipeline_mode = #tpu.pipeline_mode<synchronous>, transform_indices = @transform_2, window_bounds = array<i64: 128, 64>}, {transform_indices = @transform_3, window_bounds = array<i64: 2, 64, 1>}]} {
    %c0_i32 = arith.constant 0 : i32
    %0 = arith.cmpi eq, %arg1, %c0_i32 : i32
    %1 = arith.extui %0 : i1 to i32
    %c0_i32_0 = arith.constant 0 : i32
    %2 = arith.cmpi ne, %1, %c0_i32_0 : i32
    scf.if %2 {
      %cst_14 = arith.constant 0.000000e+00 : f32
      %15 = vector.broadcast %cst_14 : f32 to vector<2x64xf32>
      %c0_15 = arith.constant 0 : index
      %c0_16 = arith.constant 0 : index
      %16 = vector.load %arg6[%c0_15, %c0_16] : memref<2x64xf32, #tpu.memory_space<vmem>>, vector<2x64xf32>
      tpu.vector_store %arg6[%c0_15, %c0_16], %15 {strides = array<i32>} : memref<2x64xf32, #tpu.memory_space<vmem>>, vector<2x64xf32>,
      %cst_17 = arith.constant 0xFF800000 : f32
      %17 = vector.broadcast %cst_17 : f32 to vector<2x64xf32>
      %c0_18 = arith.constant 0 : index
      %c0_19 = arith.constant 0 : index
      %18 = vector.load %arg7[%c0_18, %c0_19] : memref<2x64xf32, #tpu.memory_space<vmem>>, vector<2x64xf32>
      tpu.vector_store %arg7[%c0_18, %c0_19], %17 {strides = array<i32>} : memref<2x64xf32, #tpu.memory_space<vmem>>, vector<2x64xf32>,
    } else {
    }
    %c0 = arith.constant 0 : index
    %c0_1 = arith.constant 0 : index
    %c0_2 = arith.constant 0 : index
    %3 = vector.load %arg2[%c0, %c0_1, %c0_2] : memref<2x64x256xf32, #tpu.memory_space<vmem>>, vector<2x64x256xf32>
    %c0_3 = arith.constant 0 : index
    %c0_4 = arith.constant 0 : index
    %4 = vector.load %arg6[%c0_3, %c0_4] : memref<2x64xf32, #tpu.memory_space<vmem>>, vector<2x64xf32>
    %cst = arith.constant dense<0.000000e+00> : vector<2x64xf32>
    %5 = vector.multi_reduction <add>, %3, %cst [2] : vector<2x64x256xf32> to vector<2x64xf32>
    %6 = arith.addf %4, %5 : vector<2x64xf32>
    %c0_5 = arith.constant 0 : index
    %c0_6 = arith.constant 0 : index
    %7 = vector.load %arg6[%c0_5, %c0_6] : memref<2x64xf32, #tpu.memory_space<vmem>>, vector<2x64xf32>
    tpu.vector_store %arg6[%c0_5, %c0_6], %6 {strides = array<i32>} : memref<2x64xf32, #tpu.memory_space<vmem>>, vector<2x64xf32>,
    %c0_7 = arith.constant 0 : index
    %c0_8 = arith.constant 0 : index
    %8 = vector.load %arg7[%c0_7, %c0_8] : memref<2x64xf32, #tpu.memory_space<vmem>>, vector<2x64xf32>
    %cst_9 = arith.constant dense<0xFF800000> : vector<2x64xf32>
    %9 = vector.multi_reduction <maximumf>, %3, %cst_9 [2] : vector<2x64x256xf32> to vector<2x64xf32>
    %10 = arith.maximumf %8, %9 : vector<2x64xf32>
    %c0_10 = arith.constant 0 : index
    %c0_11 = arith.constant 0 : index
    %11 = vector.load %arg7[%c0_10, %c0_11] : memref<2x64xf32, #tpu.memory_space<vmem>>, vector<2x64xf32>
    tpu.vector_store %arg7[%c0_10, %c0_11], %10 {strides = array<i32>} : memref<2x64xf32, #tpu.memory_space<vmem>>, vector<2x64xf32>,
    %c0_i32_12 = arith.constant 0 : i32
    %12 = arith.cmpi eq, %arg1, %c0_i32_12 : i32
    %13 = arith.extui %12 : i1 to i32
    %c0_i32_13 = arith.constant 0 : i32
    %14 = arith.cmpi ne, %13, %c0_i32_13 : i32
    scf.if %14 {
      %c0_14 = arith.constant 0 : index
      %c0_15 = arith.constant 0 : index
      %15 = vector.load %arg6[%c0_14, %c0_15] : memref<2x64xf32, #tpu.memory_space<vmem>>, vector<2x64xf32>
      %cst_16 = arith.constant 3.906250e-03 : f32
      %16 = vector.broadcast %cst_16 : f32 to vector<2x64xf32>
      %17 = arith.mulf %15, %16 : vector<2x64xf32>
      %c0_17 = arith.constant 0 : index
      %c0_18 = arith.constant 0 : index
      %18 = vector.load %arg7[%c0_17, %c0_18] : memref<2x64xf32, #tpu.memory_space<vmem>>, vector<2x64xf32>
      %19 = tpu.concatenate %17, %18 in 0 : vector<2x64xf32>, vector<2x64xf32> -> vector<4x64xf32>
      %c0_19 = arith.constant 0 : index
      %c0_20 = arith.constant 0 : index
      %20 = vector.load %arg3[%c0_19, %c0_20] : memref<64x128xf32, #tpu.memory_space<vmem>>, vector<64x128xf32>
      %cst_21 = arith.constant dense<0.000000e+00> : vector<4x128xf32>
      %21 = tpu.matmul %19, %20, %cst_21 {dimension_numbers = #tpu.dot_dimension_numbers<[1], [0], [0], [1], [0, 0, 1, 1], [], []>} : vector<4x64xf32>, vector<64x128xf32>, vector<4x128xf32> -> vector<4x128xf32>
      %cst_22 = arith.constant 0.000000e+00 : f32
      %22 = vector.broadcast %cst_22 : f32 to vector<4x128xf32>
      %23 = arith.maximumf %21, %22 : vector<4x128xf32>
      %24 = vector.extract_strided_slice %23 {offsets = [0, 0], sizes = [2, 128], strides = [1, 1]} : vector<4x128xf32> to vector<2x128xf32>
      %25 = vector.extract_strided_slice %23 {offsets = [2, 0], sizes = [2, 128], strides = [1, 1]} : vector<4x128xf32> to vector<2x128xf32>
      %26 = arith.addf %24, %25 : vector<2x128xf32>
      %c0_23 = arith.constant 0 : index
      %c0_24 = arith.constant 0 : index
      %27 = vector.load %arg4[%c0_23, %c0_24] : memref<128x64xf32, #tpu.memory_space<vmem>>, vector<128x64xf32>
      %cst_25 = arith.constant dense<0.000000e+00> : vector<2x64xf32>
      %28 = tpu.matmul %26, %27, %cst_25 {dimension_numbers = #tpu.dot_dimension_numbers<[1], [0], [0], [1], [0, 0, 1, 1], [], []>} : vector<2x128xf32>, vector<128x64xf32>, vector<2x64xf32> -> vector<2x64xf32>
      %cst_26 = arith.constant 0.000000e+00 : f32
      %29 = vector.broadcast %cst_26 : f32 to vector<2x64xf32>
      %30 = arith.subf %29, %28 : vector<2x64xf32>
      %31 = math.exp %30 : vector<2x64xf32>
      %cst_27 = arith.constant 1.000000e+00 : f32
      %32 = vector.broadcast %cst_27 : f32 to vector<2x64xf32>
      %33 = arith.addf %32, %31 : vector<2x64xf32>
      %cst_28 = arith.constant 1.000000e+00 : f32
      %34 = vector.broadcast %cst_28 : f32 to vector<2x64xf32>
      %35 = arith.divf %34, %33 : vector<2x64xf32>
      %36 = vector.shape_cast %35 : vector<2x64xf32> to vector<2x64x1xf32>
      %c0_29 = arith.constant 0 : index
      %c0_30 = arith.constant 0 : index
      %c0_31 = arith.constant 0 : index
      %37 = vector.load %arg5[%c0_29, %c0_30, %c0_31] : memref<2x64x1xf32, #tpu.memory_space<vmem>>, vector<2x64x1xf32>
      tpu.vector_store %arg5[%c0_29, %c0_30, %c0_31], %36 {strides = array<i32>} : memref<2x64x1xf32, #tpu.memory_space<vmem>>, vector<2x64x1xf32>,
    } else {
    }
    return
  }
  func.func @transform_0(%arg0: i32, %arg1: i32) -> (i32, i32, i32) {
    %c0_i32 = arith.constant 0 : i32
    %c0_i32_0 = arith.constant 0 : i32
    return %arg0, %c0_i32, %arg1 : i32, i32, i32
  }
  func.func @transform_1(%arg0: i32, %arg1: i32) -> (i32, i32) {
    %c0_i32 = arith.constant 0 : i32
    %c0_i32_0 = arith.constant 0 : i32
    %c0_i32_1 = arith.constant 0 : i32
    return %c0_i32, %c0_i32_0 : i32, i32
  }
  func.func @transform_2(%arg0: i32, %arg1: i32) -> (i32, i32) {
    %c0_i32 = arith.constant 0 : i32
    %c0_i32_0 = arith.constant 0 : i32
    %c0_i32_1 = arith.constant 0 : i32
    return %c0_i32, %c0_i32_0 : i32, i32
  }
  func.func @transform_3(%arg0: i32, %arg1: i32) -> (i32, i32, i32) {
    %c0_i32 = arith.constant 0 : i32
    %c0_i32_0 = arith.constant 0 : i32
    %c0_i32_1 = arith.constant 0 : i32
    return %arg0, %c0_i32, %c0_i32_0 : i32, i32, i32
  }
}

</mosaic_0001>

<bundles_post_ra>
// kernel: channel_attention.1
= control target key start
LH: loop header
LB: loop body
LE: loop exit
PB: predicated region body
PF: predicated region fallthrough
CT: control target
= control target key end

     0   :  { %vm18_vm0 = vcmask 517120   ;;  %vm774_vm1 = vmmov 0   ;;  %vm129_vm2 = vcmask 130112   ;;  %vm136_vm3 = vcmask 195712   ;;  %s1187_s0 = inlined_call_operand.vmem [shape: f32[2,64,256], index: 0, kind: input, shape index: {}]   ;;  %s1188_s1 = inlined_call_operand.vmem [shape: f32[64,128], index: 1, kind: input, shape index: {}]   ;;  %s1189_s2 = inlined_call_operand.vmem [shape: f32[128,64], index: 2, kind: input, shape index: {}]   ;;  %s1190_s3 = inlined_call_operand.vmem [shape: f32[2,64,1], index: 3, kind: output, shape index: {}]  }
   0x1   :  { %v37_v0 = vld [vmem:[%s1187_s0 + $0x80] sm:$0xff]  ;;  %v38_v1 = vld [vmem:[%s1187_s0 + $0x88] sm:$0xff]  ;;  %v39_v5 = vld [vmem:[%s1187_s0 + $0x90] sm:$0xff]  ;;  %vm143_vm4 = vcmask 261312   ;;  %vm150_vm5 = vcmask 326912   ;;  %vm157_vm6 = vcmask 392512  }
   0x2   :  { %v21_v2 = vld [vmem:[%s1187_s0] sm:$0xff]  ;;  %v78_v3 = vadd.f32 %v38_v1, %v37_v0  ;;  %v22_v4 = vld [vmem:[%s1187_s0 + $0x8] sm:$0xff]  ;;  %v40_v6 = vld [vmem:[%s1187_s0 + $0x98] sm:$0xff]  ;;  %v243_v15 = vmax.f32 %v37_v0, %v38_v1  ;;  %v771_v0 = vmov 0.0   ;;  %v772_v1 = vmov -inf  }
   0x3   :  { %v54_v7 = vadd.f32 %v22_v4, %v21_v2  ;;  %v23_v8 = vld [vmem:[%s1187_s0 + $0x10] sm:$0xff]  ;;  %v24_v9 = vld [vmem:[%s1187_s0 + $0x18] sm:$0xff]  ;;  %v81_v10 = vadd.f32 %v40_v6, %v39_v5  ;;  %v219_v13 = vmax.f32 %v21_v2, %v22_v4  ;;  %v246_v14 = vmax.f32 %v39_v5, %v40_v6  ;;  %v41_v16 = vld [vmem:[%s1187_s0 + $0xa0] sm:$0xff]  ;;  %19 = vst.msk [vmem:[#allocation2] sm:$0x3] %vm18_vm0, %v771_v0 }
   0x4   :  { %79 = vadd.xlane.f32.xlu1 %v78_v3  ;;  %v57_v11 = vadd.f32 %v24_v9, %v23_v8  ;;  %v222_v12 = vmax.f32 %v23_v8, %v24_v9  ;;  %v42_v17 = vld [vmem:[%s1187_s0 + $0xa8] sm:$0xff]  ;;  %v25_v18 = vld [vmem:[%s1187_s0 + $0x20] sm:$0xff]  ;;  %v43_v24 = vld [vmem:[%s1187_s0 + $0xb0] sm:$0xff]  ;;  %20 = vst.msk [vmem:[#allocation3] sm:$0x3] %vm18_vm0, %v772_v1  ;;  %v773_v5 = vmov 0.0|0.0   ;;  %689 = vmatprep.mubr.msk.f32.mxu0 %vm774_vm1, %v771_v0 }
   0x5   :  { %55 = vadd.xlane.f32.xlu0 %v54_v7  ;;  %v26_v19 = vld [vmem:[%s1187_s0 + $0x28] sm:$0xff]  ;;  %v84_v20 = vadd.f32 %v42_v17, %v41_v16  ;;  %v249_v22 = vmax.f32 %v41_v16, %v42_v17  ;;  %v44_v25 = vld [vmem:[%s1187_s0 + $0xb8] sm:$0xff]  ;;  %v27_v26 = vld [vmem:[%s1187_s0 + $0x30] sm:$0xff]  ;;  %727 = vmatprep.subr.bf16.mxu0 %v773_v5  ;;  %vm164_vm7 = vcmask 458112   ;;  %vm171_vm8 = vcmask 523712  }
   0x6   :  { %v60_v21 = vadd.f32 %v26_v19, %v25_v18  ;;  %v225_v23 = vmax.f32 %v25_v18, %v26_v19  ;;  %v28_v27 = vld [vmem:[%s1187_s0 + $0x38] sm:$0xff]  ;;  %v87_v28 = vadd.f32 %v44_v25, %v43_v24  ;;  %v252_v30 = vmax.f32 %v43_v24, %v44_v25  ;;  %v45_v32 = vld [vmem:[%s1187_s0 + $0xc0] sm:$0xff]  ;;  %v46_v33 = vld [vmem:[%s1187_s0 + $0xc8] sm:$0xff]  ;;  %739 = vmatprep.subr.bf16.mxu1 %v773_v5 }
   0x7   :  { %v63_v29 = vadd.f32 %v28_v27, %v27_v26  ;;  %v228_v31 = vmax.f32 %v27_v26, %v28_v27  ;;  %v29_v34 = vld [vmem:[%s1187_s0 + $0x40] sm:$0xff]  ;;  %v30_v35 = vld [vmem:[%s1187_s0 + $0x48] sm:$0xff]  ;;  %v90_v36 = vadd.f32 %v46_v33, %v45_v32  ;;  %v255_v38 = vmax.f32 %v45_v32, %v46_v33  ;;  %v47_v40 = vld [vmem:[%s1187_s0 + $0xd0] sm:$0xff]  ;;  %724 = vmatprep.mubr.msk.f32.mxu1 %vm774_vm1, %v771_v0 }
   0x8   :  { %82 = vadd.xlane.f32.xlu1 %v81_v10  ;;  %v66_v37 = vadd.f32 %v30_v35, %v29_v34  ;;  %v231_v39 = vmax.f32 %v29_v34, %v30_v35  ;;  %v48_v41 = vld [vmem:[%s1187_s0 + $0xd8] sm:$0xff]  ;;  %v31_v42 = vld [vmem:[%s1187_s0 + $0x50] sm:$0xff]  ;;  %v49_v48 = vld [vmem:[%s1187_s0 + $0xe0] sm:$0xff]  ;;  %vm212_vm9 = vcmask 1041409   ;;  %vm374_vm10 = vcmask 1041408  }
   0x9   :  { %58 = vadd.xlane.f32.xlu0 %v57_v11  ;;  %v32_v43 = vld [vmem:[%s1187_s0 + $0x58] sm:$0xff]  ;;  %v93_v44 = vadd.f32 %v48_v41, %v47_v40  ;;  %v258_v46 = vmax.f32 %v47_v40, %v48_v41  ;;  %v50_v49 = vld [vmem:[%s1187_s0 + $0xe8] sm:$0xff]  ;;  %v33_v50 = vld [vmem:[%s1187_s0 + $0x60] sm:$0xff]  ;;  %vm384_vm11 = vcmask 523264   ;;  %vm625_vm12 = vcmask 7168  }
   0xa   :  { %v69_v45 = vadd.f32 %v32_v43, %v31_v42  ;;  %v234_v47 = vmax.f32 %v31_v42, %v32_v43  ;;  %v34_v51 = vld [vmem:[%s1187_s0 + $0x68] sm:$0xff]  ;;  %v96_v52 = vadd.f32 %v50_v49, %v49_v48  ;;  %v261_v54 = vmax.f32 %v49_v48, %v50_v49  ;;  %v51_v56 = vld [vmem:[%s1187_s0 + $0xf0] sm:$0xff]  ;;  %v52_v57 = vld [vmem:[%s1187_s0 + $0xf8] sm:$0xff] }
   0xb   :  { %v72_v53 = vadd.f32 %v34_v51, %v33_v50  ;;  %v237_v55 = vmax.f32 %v33_v50, %v34_v51  ;;  %v35_v58 = vld [vmem:[%s1187_s0 + $0x70] sm:$0xff]  ;;  %v36_v59 = vld [vmem:[%s1187_s0 + $0x78] sm:$0xff]  ;;  %v99_v60 = vadd.f32 %v52_v57, %v51_v56  ;;  %v264_v62 = vmax.f32 %v51_v56, %v52_v57  ;;  %v376_v2 = vld [vmem:[%s1188_s1] sm:$0xff] }
   0xc   :  { %223 = vmax.xlane.f32.xlu1 %v222_v12  ;;  %v75_v61 = vadd.f32 %v36_v59, %v35_v58  ;;  %v240_v63 = vmax.f32 %v35_v58, %v36_v59  ;;  %v377_v3 = vld [vmem:[%s1188_s1 + $0x8] sm:$0xff]  ;;  %v378_v6 = vld [vmem:[%s1188_s1 + $0x10] sm:$0xff]  ;;  %v379_v7 = vld [vmem:[%s1188_s1 + $0x18] sm:$0xff]  ;;  %v118_v50 = vlaneseq }
   0xd   :  { %220 = vmax.xlane.f32.xlu0 %v219_v13  ;;  %v728_v4 = vpack.c.bf16 %v377_v3, %v376_v2  ;;  %v380_v8 = vld [vmem:[%s1188_s1 + $0x20] sm:$0xff]  ;;  %v731_v9 = vpack.c.bf16 %v379_v7, %v378_v6  ;;  %v381_v10 = vld [vmem:[%s1188_s1 + $0x28] sm:$0xff]  ;;  %v382_v12 = vld [vmem:[%s1188_s1 + $0x30] sm:$0xff] }
   0xe   :  { %v734_v11 = vpack.c.bf16 %v381_v10, %v380_v8  ;;  %v383_v13 = vld [vmem:[%s1188_s1 + $0x38] sm:$0xff]  ;;  %v464_v16 = vld [vmem:[%s1189_s2 + $0x8] sm:$0xff]  ;;  %v465_v17 = vld [vmem:[%s1189_s2 + $0x10] sm:$0xff]  ;;  %v1004_v56 = vshrl.u32 %v118_v50, 7 }
   0xf   :  { %729 = vmatpush3.bf16.msra.mxu0 %v728_v4  ;;  %v466_v19 = vld [vmem:[%s1189_s2 + $0x18] sm:$0xff]  ;;  %v469_v24 = vld [vmem:[%s1189_s2 + $0x30] sm:$0xff]  ;;  %v471_v27 = vld [vmem:[%s1189_s2 + $0x40] sm:$0xff] }
  0x10   :  { %247 = vmax.xlane.f32.xlu1 %v246_v14  ;;  %730 = vmatprep.subr.bf16.mxu0 %v773_v5  ;;  %v737_v14 = vpack.c.bf16 %v383_v13, %v382_v12  ;;  %v470_v25 = vld [vmem:[%s1189_s2 + $0x38] sm:$0xff] }
  0x11   :  { %244 = vmax.xlane.f32.xlu0 %v243_v15  ;;  %v463_v15 = vld [vmem:[%s1189_s2] sm:$0xff]  ;;  %v749_v26 = vpack.c.bf16 %v470_v25, %v469_v24 }
  0x12   :  { %v740_v18 = vpack.c.bf16 %v464_v16, %v463_v15 }
  0x13   :  { %732 = vmatpush3.bf16.msra.mxu0 %v731_v9 }
  0x14   :  { %85 = vadd.xlane.f32.xlu1 %v84_v20  ;;  %733 = vmatprep.subr.bf16.mxu0 %v773_v5  ;;  %v743_v20 = vpack.c.bf16 %v466_v19, %v465_v17 }
  0x15   :  { %61 = vadd.xlane.f32.xlu0 %v60_v21  ;;  %741 = vmatpush3.bf16.msra.mxu1 %v740_v18  ;;  %v467_v21 = vld [vmem:[%s1189_s2 + $0x20] sm:$0xff] }
  0x16   :  { %742 = vmatprep.subr.bf16.mxu1 %v773_v5 }
  0x17   :  { %735 = vmatpush3.bf16.msra.mxu0 %v734_v11 }
  0x18   :  { %250 = vmax.xlane.f32.xlu1 %v249_v22  ;;  %736 = vmatprep.subr.bf16.mxu0 %v773_v5  ;;  %v468_v22 = vld [vmem:[%s1189_s2 + $0x28] sm:$0xff] }
  0x19   :  { %226 = vmax.xlane.f32.xlu0 %v225_v23  ;;  %744 = vmatpush3.bf16.msra.mxu1 %v743_v20  ;;  %v746_v23 = vpack.c.bf16 %v468_v22, %v467_v21 }
  0x1a   :  { %745 = vmatprep.subr.bf16.mxu1 %v773_v5 }
  0x1b   :  { %738 = vmatpush3.bf16.msra.mxu0 %v737_v14 }
  0x1c   :  { %88 = vadd.xlane.f32.xlu1 %v87_v28  ;;  %v472_v28 = vld [vmem:[%s1189_s2 + $0x48] sm:$0xff] }
  0x1d   :  { %64 = vadd.xlane.f32.xlu0 %v63_v29  ;;  %747 = vmatpush3.bf16.msra.mxu1 %v746_v23  ;;  %v752_v29 = vpack.c.bf16 %v472_v28, %v471_v27 }
  0x1e   :  { %748 = vmatprep.subr.bf16.mxu1 %v773_v5 }
  0x20   :  { %253 = vmax.xlane.f32.xlu1 %v252_v30  ;;  %v473_v30 = vld [vmem:[%s1189_s2 + $0x50] sm:$0xff] }
  0x21   :  { %229 = vmax.xlane.f32.xlu0 %v228_v31  ;;  %750 = vmatpush3.bf16.msra.mxu1 %v749_v26  ;;  %v474_v31 = vld [vmem:[%s1189_s2 + $0x58] sm:$0xff] }
  0x22   :  { %751 = vmatprep.subr.bf16.mxu1 %v773_v5  ;;  %v755_v32 = vpack.c.bf16 %v474_v31, %v473_v30 }
  0x24   :  { %91 = vadd.xlane.f32.xlu1 %v90_v36 }
  0x25   :  { %67 = vadd.xlane.f32.xlu0 %v66_v37  ;;  %753 = vmatpush3.bf16.msra.mxu1 %v752_v29 }
  0x26   :  { %754 = vmatprep.subr.bf16.mxu1 %v773_v5 }
  0x28   :  { %256 = vmax.xlane.f32.xlu1 %v255_v38 }
  0x29   :  { %232 = vmax.xlane.f32.xlu0 %v231_v39  ;;  %756 = vmatpush3.bf16.msra.mxu1 %v755_v32 }
  0x2a   :  { %757 = vmatprep.subr.bf16.mxu1 %v773_v5 }
  0x2c   :  { %94 = vadd.xlane.f32.xlu1 %v93_v44 }
  0x2d   :  { %70 = vadd.xlane.f32.xlu0 %v69_v45 }
  0x30   :  { %259 = vmax.xlane.f32.xlu1 %v258_v46 }
  0x31   :  { %235 = vmax.xlane.f32.xlu0 %v234_v47 }
  0x34   :  { %97 = vadd.xlane.f32.xlu1 %v96_v52 }
  0x35   :  { %73 = vadd.xlane.f32.xlu0 %v72_v53  ;;  %v119_v53 = vand.u32 127, %v118_v50 }
  0x37   :  { %v131_v57 = vadd.s32 4294967280, %v119_v53  ;;  %v138_v59 = vadd.s32 4294967272, %v119_v53  ;;  %v166_v1 = vadd.s32 4294967240, %v119_v53  ;;  %v122_v2 = vsub.s32 %v119_v53, %v1004_v56 }
  0x38   :  { %262 = vmax.xlane.f32.xlu1 %v261_v54 }
  0x39   :  { %238 = vmax.xlane.f32.xlu0 %v237_v55  ;;  %v124_v55 = vadd.s32 4294967288, %v119_v53  ;;  %v134_v3 = vsub.s32 %v131_v57, %v1004_v56  ;;  %v1016_v6 = vsub.s32 %v138_v59, %v1004_v56  ;;  %v1032_v13 = vsub.s32 %v166_v1, %v1004_v56 }
  0x3b   :  { %v127_v0 = vsub.s32 %v124_v55, %v1004_v56 }
  0x3c   :  { %100 = vadd.xlane.f32.xlu1 %v99_v60  ;;  %v145_v60 = vadd.s32 4294967264, %v119_v53 }
  0x3d   :  { %76 = vadd.xlane.f32.xlu0 %v75_v61 }
  0x3e   :  { %v1019_v7 = vsub.s32 %v145_v60, %v1004_v56 }
  0x40   :  { %265 = vmax.xlane.f32.xlu1 %v264_v62  ;;  %v152_v62 = vadd.s32 4294967256, %v119_v53 }
  0x41   :  { %241 = vmax.xlane.f32.xlu0 %v240_v63  ;;  %v159_v63 = vadd.s32 4294967248, %v119_v53 }
  0x42   :  { %v1024_v9 = vsub.s32 %v152_v62, %v1004_v56 }
  0x43   :  { %v1027_v10 = vsub.s32 %v159_v63, %v1004_v56 }
  0x91   :  { %v964_v33 = vpop.xlane.xlu1 %79 }
  0x92   :  { %v966_v34 = vpop.xlane.xlu0 %55  ;;  %v176_v19 = vrot.slane %v964_v33, %v122_v2 }
  0x93   :  { %v123_v20 = vrot.slane %v966_v34, %v122_v2 }
  0x95   :  { %v968_v35 = vpop.xlane.xlu1 %82 }
  0x96   :  { %v970_v36 = vpop.xlane.xlu0 %58  ;;  %v180_v11 = vrot.slane %v968_v35, %v127_v0 }
  0x97   :  { %v128_v12 = vrot.slane %v970_v36, %v127_v0 }
  0x98   :  { %v181_v27 = vsel %vm129_vm2, %v180_v11, %v176_v19 }
  0x99   :  { %v972_v37 = vpop.xlane.xlu1 %223  ;;  %v130_v28 = vsel %vm129_vm2, %v128_v12, %v123_v20 }
  0x9a   :  { %v974_v38 = vpop.xlane.xlu0 %220  ;;  %v290_v14 = vrot.slane %v972_v37, %v127_v0 }
  0x9b   :  { %v286_v15 = vrot.slane %v974_v38, %v122_v2 }
  0x9d   :  { %v976_v39 = vpop.xlane.xlu1 %247  ;;  %v291_v30 = vsel %vm129_vm2, %v290_v14, %v286_v15 }
  0x9e   :  { %v978_v40 = vpop.xlane.xlu0 %244  ;;  %v329_v16 = vrot.slane %v976_v39, %v127_v0 }
  0x9f   :  { %v325_v17 = vrot.slane %v978_v40, %v122_v2 }
  0xa1   :  { %v980_v41 = vpop.xlane.xlu1 %85  ;;  %v330_v31 = vsel %vm129_vm2, %v329_v16, %v325_v17 }
  0xa2   :  { %v982_v42 = vpop.xlane.xlu0 %61  ;;  %v185_v21 = vrot.slane %v980_v41, %v134_v3 }
  0xa3   :  { %v135_v22 = vrot.slane %v982_v42, %v134_v3 }
  0xa4   :  { %v186_v35 = vsel %vm136_vm3, %v185_v21, %v181_v27  ;;  %v218_v21 = vld [vmem:[#allocation3] sm:$0x3] }
  0xa5   :  { %v984_v43 = vpop.xlane.xlu1 %250  ;;  %v137_v36 = vsel %vm136_vm3, %v135_v22, %v130_v28 }
  0xa6   :  { %v986_v44 = vpop.xlane.xlu0 %226  ;;  %v334_v24 = vrot.slane %v984_v43, %v134_v3 }
  0xa7   :  { %v295_v25 = vrot.slane %v986_v44, %v134_v3  ;;  %v53_v3 = vld [vmem:[#allocation2] sm:$0x3] }
  0xa8   :  { %v335_v40 = vsel %vm136_vm3, %v334_v24, %v330_v31 }
  0xa9   :  { %v988_v45 = vpop.xlane.xlu1 %88  ;;  %v296_v41 = vsel %vm136_vm3, %v295_v25, %v291_v30  ;;  %v476_v30 = vld [vmem:[%s1189_s2 + $0x68] sm:$0xff] }
  0xaa   :  { %v990_v46 = vpop.xlane.xlu0 %64  ;;  %v190_v26 = vrot.slane %v988_v45, %v1016_v6 }
  0xab   :  { %v142_v29 = vrot.slane %v990_v46, %v1016_v6 }
  0xac   :  { %v191_v42 = vsel %vm143_vm4, %v190_v26, %v186_v35 }
  0xad   :  { %v992_v47 = vpop.xlane.xlu1 %253  ;;  %v144_v44 = vsel %vm143_vm4, %v142_v29, %v137_v36  ;;  %v475_v29 = vld [vmem:[%s1189_s2 + $0x60] sm:$0xff] }
  0xae   :  { %v994_v48 = vpop.xlane.xlu0 %229  ;;  %v339_v45 = vrot.slane %v992_v47, %v1016_v6  ;;  %v758_v31 = vpack.c.bf16 %v476_v30, %v475_v29 }
  0xaf   :  { %v300_v46 = vrot.slane %v994_v48, %v1016_v6 }
  0xb0   :  { %v340_v63 = vsel %vm143_vm4, %v339_v45, %v335_v40  ;;  %759 = vmatpush3.bf16.msra.mxu1 %v758_v31  ;;  %v557_v45 = vsub.s32 0, %v1004_v56 }
  0xb1   :  { %v996_v49 = vpop.xlane.xlu1 %91  ;;  %760 = vmatprep.subr.bf16.mxu1 %v773_v5 }
  0xb2   :  { %v998_v51 = vpop.xlane.xlu0 %67  ;;  %v195_v32 = vrot.slane %v996_v49, %v1019_v7 }
  0xb3   :  { %v149_v33 = vrot.slane %v998_v51, %v1019_v7 }
  0xb4   :  { %v196_v50 = vsel %vm150_vm5, %v195_v32, %v191_v42  ;;  %v477_v32 = vld [vmem:[%s1189_s2 + $0x70] sm:$0xff] }
  0xb5   :  { %v1000_v52 = vpop.xlane.xlu1 %256  ;;  %v151_v51 = vsel %vm150_vm5, %v149_v33, %v144_v44  ;;  %v478_v33 = vld [vmem:[%s1189_s2 + $0x78] sm:$0xff] }
  0xb6   :  { %v1002_v54 = vpop.xlane.xlu0 %232  ;;  %v344_v53 = vrot.slane %v1000_v52, %v1019_v7 }
  0xb7   :  { %v305_v55 = vrot.slane %v1002_v54, %v1019_v7 }
  0xb8   :  { %v345_v6 = vsel %vm150_vm5, %v344_v53, %v340_v63 }
  0xb9   :  { %v1006_v58 = vpop.xlane.xlu1 %94 }
  0xba   :  { %v1008_v61 = vpop.xlane.xlu0 %70  ;;  %v200_v37 = vrot.slane %v1006_v58, %v1024_v9 }
  0xbb   :  { %v156_v38 = vrot.slane %v1008_v61, %v1024_v9 }
  0xbc   :  { %v201_v58 = vsel %vm157_vm6, %v200_v37, %v196_v50  ;;  %v592_v50 = vsub.s32 1, %v1004_v56 }
  0xbd   :  { %v1013_v4 = vpop.xlane.xlu1 %259  ;;  %v158_v47 = vsel %vm157_vm6, %v156_v38, %v151_v51 }
  0xbe   :  { %v1021_v8 = vpop.xlane.xlu0 %235  ;;  %v349_v48 = vrot.slane %v1013_v4, %v1024_v9  ;;  %v301_v4 = vsel %vm143_vm4, %v300_v46, %v296_v41 }
  0xbf   :  { %v310_v61 = vrot.slane %v1021_v8, %v1024_v9  ;;  %v306_v9 = vsel %vm150_vm5, %v305_v55, %v301_v4 }
  0xc0   :  { %v350_v11 = vsel %vm157_vm6, %v349_v48, %v345_v6 }
  0xc1   :  { %v98_v18 = vpop.xlane.xlu1 %97 }
  0xc2   :  { %v74_v23 = vpop.xlane.xlu0 %73  ;;  %v205_v43 = vrot.slane %v98_v18, %v1027_v10 }
  0xc3   :  { %v163_v49 = vrot.slane %v74_v23, %v1027_v10 }
  0xc4   :  { %v206_v62 = vsel %vm164_vm7, %v205_v43, %v201_v58 }
  0xc5   :  { %v263_v34 = vpop.xlane.xlu1 %262  ;;  %v165_v0 = vsel %vm164_vm7, %v163_v49, %v158_v47 }
  0xc6   :  { %v239_v39 = vpop.xlane.xlu0 %238  ;;  %v354_v52 = vrot.slane %v263_v34, %v1027_v10  ;;  %v761_v34 = vpack.c.bf16 %v478_v33, %v477_v32 }
  0xc7   :  { %v315_v1 = vrot.slane %v239_v39, %v1027_v10  ;;  %v311_v10 = vsel %vm157_vm6, %v310_v61, %v306_v9 }
  0xc8   :  { %v355_v16 = vsel %vm164_vm7, %v354_v52, %v350_v11  ;;  %762 = vmatpush3.bf16.msra.mxu1 %v761_v34 }
  0xc9   :  { %v101_v57 = vpop.xlane.xlu1 %100  ;;  %v316_v19 = vsel %vm164_vm7, %v315_v1, %v311_v10 }
  0xca   :  { %v210_v59 = vrot.slane %v101_v57, %v1032_v13  ;;  %v77_v60 = vpop.xlane.xlu0 %76 }
  0xcb   :  { %v170_v54 = vrot.slane %v77_v60, %v1032_v13 }
  0xcc   :  { %v211_v2 = vsel %vm171_vm8, %v210_v59, %v206_v62 }
  0xcd   :  { %v172_v7 = vsel %vm171_vm8, %v170_v54, %v165_v0  ;;  %v266_v8 = vpop.xlane.xlu1 %265 }
  0xce   :  { %v213_v12 = vsel %vm212_vm9, %v211_v2, %v172_v7  ;;  %v359_v14 = vrot.slane %v266_v8, %v1032_v13  ;;  %v242_v15 = vpop.xlane.xlu0 %241 }
  0xcf   :  { %v320_v17 = vrot.slane %v242_v15, %v1032_v13  ;;  %v215_v18 = vadd.f32 %v213_v12, %v53_v3 }
  0xd0   :  { %v360_v20 = vsel %vm171_vm8, %v359_v14, %v355_v16 }
  0xd1   :  { %v321_v22 = vsel %vm171_vm8, %v320_v17, %v316_v19  ;;  %217 = vst.msk [vmem:[#allocation2] sm:$0x3] %vm18_vm0, %v215_v18 }
  0xd2   :  { %v361_v23 = vsel %vm212_vm9, %v360_v20, %v321_v22 }
  0xd3   :  { %v363_v24 = vmax.f32 %v218_v21, %v361_v23 }
  0xd5   :  { %364 = vst.msk [vmem:[#allocation3] sm:$0x3] %vm18_vm0, %v363_v24 }
  0xd8   :  { %v368_v25 = vld [vmem:[#allocation2] sm:$0x3] }
  0xd9   :  { %v369_v27 = vmul.f32 0.00390625, %v368_v25 }
  0xdc   :  { %v370_v26 = vld [vmem:[#allocation3] sm:$0x3] }
  0xdd   :  { %v372_v13 = vrot.slane %v370_v26, 6 }
  0xdf   :  { %v375_v28 = vsel %vm374_vm10, %v369_v27, %v372_v13 }
  0xe0   :  { %690 = vmatmul.mubr.msk.f32.vlgmr.msra.gmra.mrb[0].mxu0 %vm384_vm11, %v375_v28 }
 0x1b3   :  { %v454_v35 = vpop.f32.mrb[0].mxu0 }
 0x1b4   :  { %v458_v36 = vmax.f32 %v454_v35, 0.0  ;;  %v691_v37 = vpop.f32.mrb[1].mxu0 }
 0x1b6   :  { %v460_v38 = vrot.slane %v458_v36, 2 }
 0x1b8   :  { %v462_v39 = vadd.f32 %v460_v38, %v458_v36 }
 0x1ba   :  { %725 = vmatmul.mubr.f32.vlgmr.msra.gmra.mrb[0].mxu1 %v462_v39 }
 0x28d   :  { %v545_v40 = vpop.f32.mrb[0].mxu1 }
 0x28e   :  { %v549_v41 = vsub.f32 0.0, %v545_v40  ;;  %v726_v42 = vpop.f32.mrb[1].mxu1 }
 0x290   :  { %v550_v5 = vmul.f32 1.442695, %v549_v41 }
 0x292   :  { %767 = vpow2.f32 %v550_v5 }
 0x29c   :  { %v768_v43 = vpop.eup %767 }
 0x29d   :  { %v552_v44 = vadd.f32 1.0, %v768_v43 }
 0x29f   :  { %769 = vrcp.f32 %v552_v44 }
 0x2a9   :  { %v770_v46 = vpop.eup %769 }
 0x2aa   :  { %v558_v49 = vrot.slane %v770_v46, %v557_v45  ;;  %v593_v51 = vrot.slane %v770_v46, %v592_v50 }
 0x2ac   :  { %564 = vbcast.lane.b32.xlu1 %v558_v49, 264  ;;  %560 = vbcast.lane.b32.xlu0 %v558_v49, 256 }
 0x2b0   :  { %568 = vbcast.lane.b32.xlu1 %v558_v49, 272  ;;  %576 = vbcast.lane.b32.xlu0 %v558_v49, 288 }
 0x2b4   :  { %572 = vbcast.lane.b32.xlu1 %v558_v49, 280  ;;  %584 = vbcast.lane.b32.xlu0 %v558_v49, 304 }
 0x2b8   :  { %580 = vbcast.lane.b32.xlu1 %v558_v49, 296  ;;  %595 = vbcast.lane.b32.xlu0 %v593_v51, 256 }
 0x2bc   :  { %588 = vbcast.lane.b32.xlu1 %v558_v49, 312  ;;  %603 = vbcast.lane.b32.xlu0 %v593_v51, 272 }
 0x2c0   :  { %599 = vbcast.lane.b32.xlu1 %v593_v51, 264  ;;  %611 = vbcast.lane.b32.xlu0 %v593_v51, 288 }
 0x2c4   :  { %607 = vbcast.lane.b32.xlu1 %v593_v51, 280  ;;  %619 = vbcast.lane.b32.xlu0 %v593_v51, 304 }
 0x2c8   :  { %615 = vbcast.lane.b32.xlu1 %v593_v51, 296 }
 0x2cc   :  { %623 = vbcast.lane.b32.xlu1 %v593_v51, 312 }
 0x31e   :  { %v565_v53 = vpop.permute.xlu1 %564  ;;  %v561_v55 = vpop.permute.xlu0 %560 }
 0x31f   :  { %627 = vst.msk [vmem:[%s1190_s3 + $0x8] sm:$0xff] %vm625_vm12, %v565_v53  ;;  %626 = vst.msk [vmem:[%s1190_s3] sm:$0xff] %vm625_vm12, %v561_v55 }
 0x322   :  { %v569_v56 = vpop.permute.xlu1 %568  ;;  %v577_v57 = vpop.permute.xlu0 %576 }
 0x323   :  { %628 = vst.msk [vmem:[%s1190_s3 + $0x10] sm:$0xff] %vm625_vm12, %v569_v56  ;;  %630 = vst.msk [vmem:[%s1190_s3 + $0x20] sm:$0xff] %vm625_vm12, %v577_v57 }
 0x326   :  { %v573_v58 = vpop.permute.xlu1 %572  ;;  %v585_v47 = vpop.permute.xlu0 %584 }
 0x327   :  { %629 = vst.msk [vmem:[%s1190_s3 + $0x18] sm:$0xff] %vm625_vm12, %v573_v58  ;;  %632 = vst.msk [vmem:[%s1190_s3 + $0x30] sm:$0xff] %vm625_vm12, %v585_v47 }
 0x32a   :  { %v581_v48 = vpop.permute.xlu1 %580  ;;  %v596_v59 = vpop.permute.xlu0 %595 }
 0x32b   :  { %631 = vst.msk [vmem:[%s1190_s3 + $0x28] sm:$0xff] %vm625_vm12, %v581_v48  ;;  %634 = vst.msk [vmem:[%s1190_s3 + $0x40] sm:$0xff] %vm625_vm12, %v596_v59 }
 0x32e   :  { %v589_v60 = vpop.permute.xlu1 %588  ;;  %v604_v61 = vpop.permute.xlu0 %603 }
 0x32f   :  { %633 = vst.msk [vmem:[%s1190_s3 + $0x38] sm:$0xff] %vm625_vm12, %v589_v60  ;;  %636 = vst.msk [vmem:[%s1190_s3 + $0x50] sm:$0xff] %vm625_vm12, %v604_v61 }
 0x332   :  { %v600_v62 = vpop.permute.xlu1 %599  ;;  %v612_v52 = vpop.permute.xlu0 %611 }
 0x333   :  { %635 = vst.msk [vmem:[%s1190_s3 + $0x48] sm:$0xff] %vm625_vm12, %v600_v62  ;;  %638 = vst.msk [vmem:[%s1190_s3 + $0x60] sm:$0xff] %vm625_vm12, %v612_v52 }
 0x336   :  { %v608_v54 = vpop.permute.xlu1 %607  ;;  %v620_v63 = vpop.permute.xlu0 %619 }
 0x337   :  { %637 = vst.msk [vmem:[%s1190_s3 + $0x58] sm:$0xff] %vm625_vm12, %v608_v54  ;;  %640 = vst.msk [vmem:[%s1190_s3 + $0x70] sm:$0xff] %vm625_vm12, %v620_v63 }
 0x33a   :  { %v616_v0 = vpop.permute.xlu1 %615 }
 0x33b   :  { %639 = vst.msk [vmem:[%s1190_s3 + $0x68] sm:$0xff] %vm625_vm12, %v616_v0 }
 0x33e   :  { %v624_v1 = vpop.permute.xlu1 %623 }
 0x33f   :  { %641 = vst.msk [vmem:[%s1190_s3 + $0x78] sm:$0xff] %vm625_vm12, %v624_v1 }

</bundles_post_ra>
